<compile_context>
chip_gen: v6e
topology: v6e:2x2x1
jax: 0.10.0
libtpu: 0.0.40
codegen_flags: <defaults>
</compile_context>

<pallas_src>
import jax
import jax.numpy as jnp
import numpy as np
from jax.experimental import pallas as pl
from jax.experimental.pallas import tpu as pltpu

EPS = 1e-5  # nn.BatchNorm1d default

# weight-slab row offsets (16-aligned so bf16 (16,128) tiles are never split)
_R_WCONV = 0      # rows   0: 16   (16, 80)  im2col conv weight
_R_M     = 16     # rows  16: 96   (80, 80)  channel-averaging projection
_R_W1T   = 96     # rows  96:176   (80, 40)  fc1.weight.T
_R_W2T   = 176    # rows 176:216   (40, 20)  fc2.weight.T
_R_W3T   = 224    # rows 224:244   (20,  4)  fc3.weight.T
_WSLAB_ROWS = 256


# -----------------------------------------------------------------------------
# Kernel: conv1d -> BatchNorm1d(train) -> fc1+ReLU -> fc2+ReLU -> fc3 -> log_softmax
# -----------------------------------------------------------------------------
def nn_model_kernel(x_ref, w_ref, b_ref, out_ref):
    x = x_ref[...]                                                     # (B, 16) f32
    B = x.shape[0]

    # ---- static views into the packed weight slab (bf16)
    wconv = w_ref[_R_WCONV:_R_WCONV + 16, 0:80]                        # (16, 80)
    m_proj = w_ref[_R_M:_R_M + 80, 0:80]                               # (80, 80) exact 0/1
    w1t = w_ref[_R_W1T:_R_W1T + 80, 0:40]                              # (80, 40)
    w2t = w_ref[_R_W2T:_R_W2T + 40, 0:20]                              # (40, 20)
    w3t = w_ref[_R_W3T:_R_W3T + 20, 0:4]                               # (20,  4)

    # ---- static views into the packed 1-D parameter slab (f32)
    bconv = b_ref[0:1, 0:80]                                           # conv bias, per-lane
    gamma80 = b_ref[1:2, 0:80]                                         # BN gamma, per-lane
    beta80 = b_ref[2:3, 0:80]                                          # BN beta,  per-lane
    b1 = b_ref[3:4, 0:40]
    b2 = b_ref[4:5, 0:20]
    b3 = b_ref[5:6, 0:4]

    # ---- Conv1d(1,16,k=4,s=3) as one matmul (im2col weight), out col = c*5 + t
    y = jnp.dot(x.astype(jnp.bfloat16), wconv,
                preferred_element_type=jnp.float32) + bconv            # (B, 80) f32

    # ---- BatchNorm1d(16), training mode: one 80x80 projection gives per-channel
    #      mean / mean-of-squares already broadcast to the 80-lane layout.
    #      (kept in f32: feeds the E[x^2]-E[x]^2 cancellation)
    n = jnp.float32(B * 5)
    col_sum = jnp.sum(y, axis=0, keepdims=True)                        # (1, 80)
    col_sq = jnp.sum(y * y, axis=0, keepdims=True)                     # (1, 80)
    stats = jnp.concatenate([col_sum, col_sq], axis=0)                 # (2, 80)
    ch80 = jnp.dot(stats, m_proj.astype(jnp.float32),
                   preferred_element_type=jnp.float32) * (1.0 / n)     # (2, 80)
    mean80 = ch80[0:1, :]
    var80 = jnp.maximum(ch80[1:2, :] - mean80 * mean80, 0.0)           # clamp >= 0
    inv_std80 = jax.lax.rsqrt(var80 + EPS)
    scale80 = gamma80 * inv_std80                                      # (1, 80)
    shift80 = beta80 - mean80 * scale80                                # (1, 80)
    h = y * scale80 + shift80                                          # (B, 80) f32

    # ---- fc1 + ReLU, fc2 + ReLU, fc3 (bf16 operands, f32 accumulate)
    h1 = jnp.maximum(jnp.dot(h.astype(jnp.bfloat16), w1t,
                             preferred_element_type=jnp.float32) + b1, 0.0)
    h2 = jnp.maximum(jnp.dot(h1.astype(jnp.bfloat16), w2t,
                             preferred_element_type=jnp.float32) + b2, 0.0)
    logits = jnp.dot(h2.astype(jnp.bfloat16), w3t,
                     preferred_element_type=jnp.float32) + b3          # (B, 4)

    # ---- log_softmax along dim=1
    m = jnp.max(logits, axis=1, keepdims=True)
    z = logits - m
    lse = jnp.log(jnp.sum(jnp.exp(z), axis=1, keepdims=True))
    out_ref[...] = z - lse


# -----------------------------------------------------------------------------
# Deterministic parameter init (PyTorch-like uniform(-1/sqrt(fan_in), +...))
# -----------------------------------------------------------------------------
def init_params(key):
    ks = jax.random.split(key, 8)

    def unif(k, shape, fan_in):
        bound = 1.0 / np.sqrt(fan_in)
        return jax.random.uniform(k, shape, jnp.float32, -bound, bound)

    return dict(
        conv_w=unif(ks[0], (16, 1, 4), 1 * 4),      # Conv1d weight (out, in, k)
        conv_b=unif(ks[1], (16,), 1 * 4),
        bn_gamma=jnp.ones((16,), jnp.float32),
        bn_beta=jnp.zeros((16,), jnp.float32),
        fc1_w=unif(ks[2], (40, 80), 80),
        fc1_b=unif(ks[3], (40,), 80),
        fc2_w=unif(ks[4], (20, 40), 40),
        fc2_b=unif(ks[5], (20,), 40),
        fc3_w=unif(ks[6], (4, 20), 20),
        fc3_b=unif(ks[7], (4,), 20),
    )


# -----------------------------------------------------------------------------
# One-time host-side kernel-parameter preparation (OUTSIDE jit, concrete arrays)
# -----------------------------------------------------------------------------
def prepare_kernel_params(params):
    conv_w = np.asarray(params["conv_w"], np.float32)    # (16, 1, 4)
    conv_b = np.asarray(params["conv_b"], np.float32)    # (16,)
    gamma = np.asarray(params["bn_gamma"], np.float32)   # (16,)
    beta = np.asarray(params["bn_beta"], np.float32)     # (16,)

    # im2col conv weight: conv1d(1,16,k=4,s=3) == x @ wbig, output col = c*5 + t
    wbig = np.zeros((16, 80), np.float32)
    for c in range(16):
        for t in range(5):
            for k in range(4):
                wbig[3 * t + k, c * 5 + t] += conv_w[c, 0, k]

    # channel-averaging projection: M[i, j] = 1 iff i, j belong to the same channel
    sel = np.zeros((80, 16), np.float32)
    for c in range(16):
        sel[c * 5:(c + 1) * 5, c] = 1.0
    m_proj = sel @ sel.T                                  # (80, 80), entries in {0, 1}

    # packed weight slab (bf16; M's 0/1 entries are exact in bf16)
    wslab = np.zeros((_WSLAB_ROWS, 128), np.float32)
    wslab[_R_WCONV:_R_WCONV + 16, 0:80] = wbig
    wslab[_R_M:_R_M + 80, 0:80] = m_proj
    wslab[_R_W1T:_R_W1T + 80, 0:40] = np.asarray(params["fc1_w"], np.float32).T
    wslab[_R_W2T:_R_W2T + 40, 0:20] = np.asarray(params["fc2_w"], np.float32).T
    wslab[_R_W3T:_R_W3T + 20, 0:4] = np.asarray(params["fc3_w"], np.float32).T

    # packed 1-D parameter slab (f32), gamma/beta pre-broadcast to 80 lanes
    bslab = np.zeros((8, 128), np.float32)
    for c in range(16):
        bslab[0, c * 5:(c + 1) * 5] = conv_b[c]
        bslab[1, c * 5:(c + 1) * 5] = gamma[c]
        bslab[2, c * 5:(c + 1) * 5] = beta[c]
    bslab[3, :40] = np.asarray(params["fc1_b"], np.float32)
    bslab[4, :20] = np.asarray(params["fc2_b"], np.float32)
    bslab[5, :4] = np.asarray(params["fc3_b"], np.float32)

    return dict(
        wslab=jnp.asarray(wslab, dtype=jnp.bfloat16),
        bslab=jnp.asarray(bslab, dtype=jnp.float32),
    )


# -----------------------------------------------------------------------------
# Jitted forward: single pallas_call, no grid, everything resident in VMEM.
# For production batches on v7x (2 TensorCores), add a batch grid
# (TILE_B multiple of 8, dimension_semantics=("parallel",)) and hoist the BN
# batch statistics into a small reduction pass; at demo sizes the whole batch
# fits a single invocation and the grid would only add pipeline overhead.
# -----------------------------------------------------------------------------
@jax.jit
def nn_model_forward(x, kp):
    B = x.shape[0]
    x2 = x.reshape(B, 16).astype(jnp.float32)       # == x.view(-1, 1, 16), C squeezed

    flops = 2 * B * (16 * 80 + 80 * 40 + 40 * 20 + 20 * 4) + 2 * 2 * 80 * 80
    transcendentals = B * 5 + 80                    # exp + log (softmax), rsqrt (BN)
    bytes_accessed = (x2.size * 4 + _WSLAB_ROWS * 128 * 2 + 8 * 128 * 4 + B * 4 * 4)

    return pl.pallas_call(
        nn_model_kernel,
        out_shape=jax.ShapeDtypeStruct((B, 4), jnp.float32),
        in_specs=[
            pl.BlockSpec(memory_space=pltpu.MemorySpace.VMEM),   # x
            pl.BlockSpec(memory_space=pltpu.MemorySpace.VMEM),   # weight slab
            pl.BlockSpec(memory_space=pltpu.MemorySpace.VMEM),   # bias slab
        ],
        out_specs=pl.BlockSpec(memory_space=pltpu.MemorySpace.VMEM),
        cost_estimate=pl.CostEstimate(flops=flops,
                                      transcendentals=transcendentals,
                                      bytes_accessed=bytes_accessed),
    )(x2, kp["wslab"], kp["bslab"])


# -----------------------------------------------------------------------------
# Plain-JAX reference mirroring the PyTorch forward (training-mode BatchNorm, f32)
# -----------------------------------------------------------------------------
def reference_forward(x, params):
    B = x.shape[0]
    xr = x.reshape(B, 1, 16).astype(jnp.float32)
    cols = jnp.stack([xr[:, 0, 3 * t:3 * t + 4] for t in range(5)], axis=1)  # (B,5,4)
    y = jnp.einsum("btk,ck->bct", cols, params["conv_w"][:, 0, :]) \
        + params["conv_b"][None, :, None]                                    # (B,16,5)
    mean = jnp.mean(y, axis=(0, 2), keepdims=True)
    var = jnp.mean((y - mean) ** 2, axis=(0, 2), keepdims=True)
    y = (y - mean) / jnp.sqrt(var + EPS)
    y = y * params["bn_gamma"][None, :, None] + params["bn_beta"][None, :, None]
    h = y.reshape(B, 80)
    h = jax.nn.relu(h @ params["fc1_w"].T + params["fc1_b"])
    h = jax.nn.relu(h @ params["fc2_w"].T + params["fc2_b"])
    logits = h @ params["fc3_w"].T + params["fc3_b"]
    return jax.nn.log_softmax(logits, axis=1)


if __name__ == "__main__":
    key = jax.random.PRNGKey(0)
    pkey, xkey = jax.random.split(key)
    params = init_params(pkey)
    kernel_params = prepare_kernel_params(params)   # one-time host prep, outside jit

    B = 8
    x = jax.random.normal(xkey, (B, 16), dtype=jnp.float32)

    out = nn_model_forward(x, kernel_params)
    out = jax.block_until_ready(out)

    ref = reference_forward(x, params)
    # bf16 matmul operands (f32 accumulate / f32 elementwise) -> slightly relaxed tol
    np.testing.assert_allclose(np.asarray(out), np.asarray(ref), rtol=2e-2, atol=2e-2)

    print("KERNEL_OK")
</pallas_src>

<mosaic_0001>
module attributes {stable_mosaic.version = 11 : i64} {
  func.func @nn_model_kernel(%arg0: memref<8x16xf32, #tpu.memory_space<vmem>>, %arg1: memref<256x128xbf16, #tpu.memory_space<vmem>>, %arg2: memref<8x128xf32, #tpu.memory_space<vmem>>, %arg3: memref<8x4xf32, #tpu.memory_space<vmem>>) attributes {dimension_semantics = [], scalar_prefetch = 0 : i64, scratch_operands = 0 : i64, tpu.core_type = #tpu.core_type<tc>} {
    %c0 = arith.constant 0 : index
    %c0_0 = arith.constant 0 : index
    %0 = vector.load %arg0[%c0, %c0_0] : memref<8x16xf32, #tpu.memory_space<vmem>>, vector<8x16xf32>
    %c0_1 = arith.constant 0 : index
    %c0_2 = arith.constant 0 : index
    %1 = vector.load %arg1[%c0_1, %c0_2] : memref<256x128xbf16, #tpu.memory_space<vmem>>, vector<16x80xbf16>
    %c16 = arith.constant 16 : index
    %c0_3 = arith.constant 0 : index
    %2 = vector.load %arg1[%c16, %c0_3] : memref<256x128xbf16, #tpu.memory_space<vmem>>, vector<80x80xbf16>
    %c96 = arith.constant 96 : index
    %c0_4 = arith.constant 0 : index
    %3 = vector.load %arg1[%c96, %c0_4] : memref<256x128xbf16, #tpu.memory_space<vmem>>, vector<80x40xbf16>
    %c176 = arith.constant 176 : index
    %c0_5 = arith.constant 0 : index
    %4 = vector.load %arg1[%c176, %c0_5] : memref<256x128xbf16, #tpu.memory_space<vmem>>, vector<40x20xbf16>
    %c224 = arith.constant 224 : index
    %c0_6 = arith.constant 0 : index
    %5 = vector.load %arg1[%c224, %c0_6] : memref<256x128xbf16, #tpu.memory_space<vmem>>, vector<20x4xbf16>
    %c0_7 = arith.constant 0 : index
    %c0_8 = arith.constant 0 : index
    %6 = vector.load %arg2[%c0_7, %c0_8] : memref<8x128xf32, #tpu.memory_space<vmem>>, vector<1x80xf32>
    %c1 = arith.constant 1 : index
    %c0_9 = arith.constant 0 : index
    %7 = vector.load %arg2[%c1, %c0_9] : memref<8x128xf32, #tpu.memory_space<vmem>>, vector<1x80xf32>
    %c2 = arith.constant 2 : index
    %c0_10 = arith.constant 0 : index
    %8 = vector.load %arg2[%c2, %c0_10] : memref<8x128xf32, #tpu.memory_space<vmem>>, vector<1x80xf32>
    %c3 = arith.constant 3 : index
    %c0_11 = arith.constant 0 : index
    %9 = vector.load %arg2[%c3, %c0_11] : memref<8x128xf32, #tpu.memory_space<vmem>>, vector<1x40xf32>
    %c4 = arith.constant 4 : index
    %c0_12 = arith.constant 0 : index
    %10 = vector.load %arg2[%c4, %c0_12] : memref<8x128xf32, #tpu.memory_space<vmem>>, vector<1x20xf32>
    %c5 = arith.constant 5 : index
    %c0_13 = arith.constant 0 : index
    %11 = vector.load %arg2[%c5, %c0_13] : memref<8x128xf32, #tpu.memory_space<vmem>>, vector<1x4xf32>
    %12 = arith.truncf %0 : vector<8x16xf32> to vector<8x16xbf16>
    %cst = arith.constant dense<0.000000e+00> : vector<8x80xf32>
    %13 = tpu.matmul %12, %1, %cst {dimension_numbers = #tpu.dot_dimension_numbers<[1], [0], [0], [1], [0, 0, 1, 1], [], []>} : vector<8x16xbf16>, vector<16x80xbf16>, vector<8x80xf32> -> vector<8x80xf32>
    %14 = vector.broadcast %6 : vector<1x80xf32> to vector<8x80xf32>
    %15 = arith.addf %13, %14 : vector<8x80xf32>
    %cst_14 = arith.constant dense<0.000000e+00> : vector<80xf32>
    %16 = vector.multi_reduction <add>, %15, %cst_14 [0] : vector<8x80xf32> to vector<80xf32>
    %17 = vector.shape_cast %16 : vector<80xf32> to vector<1x80xf32>
    %18 = arith.mulf %15, %15 : vector<8x80xf32>
    %cst_15 = arith.constant dense<0.000000e+00> : vector<80xf32>
    %19 = vector.multi_reduction <add>, %18, %cst_15 [0] : vector<8x80xf32> to vector<80xf32>
    %20 = vector.shape_cast %19 : vector<80xf32> to vector<1x80xf32>
    %21 = tpu.concatenate %17, %20 in 0 : vector<1x80xf32>, vector<1x80xf32> -> vector<2x80xf32>
    %22 = arith.extf %2 : vector<80x80xbf16> to vector<80x80xf32>
    %cst_16 = arith.constant dense<0.000000e+00> : vector<2x80xf32>
    %23 = tpu.matmul %21, %22, %cst_16 {dimension_numbers = #tpu.dot_dimension_numbers<[1], [0], [0], [1], [0, 0, 1, 1], [], []>} : vector<2x80xf32>, vector<80x80xf32>, vector<2x80xf32> -> vector<2x80xf32>
    %cst_17 = arith.constant 1.000000e+00 : f32
    %cst_18 = arith.constant 4.000000e+01 : f32
    %24 = arith.divf %cst_17, %cst_18 : f32
    %25 = vector.broadcast %24 : f32 to vector<2x80xf32>
    %26 = arith.mulf %23, %25 : vector<2x80xf32>
    %27 = vector.extract_strided_slice %26 {offsets = [0, 0], sizes = [1, 80], strides = [1, 1]} : vector<2x80xf32> to vector<1x80xf32>
    %28 = vector.extract_strided_slice %26 {offsets = [1, 0], sizes = [1, 80], strides = [1, 1]} : vector<2x80xf32> to vector<1x80xf32>
    %29 = arith.mulf %27, %27 : vector<1x80xf32>
    %30 = arith.subf %28, %29 : vector<1x80xf32>
    %cst_19 = arith.constant 0.000000e+00 : f32
    %31 = vector.broadcast %cst_19 : f32 to vector<1x80xf32>
    %32 = arith.maximumf %30, %31 : vector<1x80xf32>
    %cst_20 = arith.constant 9.99999974E-6 : f32
    %33 = vector.broadcast %cst_20 : f32 to vector<1x80xf32>
    %34 = arith.addf %32, %33 : vector<1x80xf32>
    %35 = math.rsqrt %34 : vector<1x80xf32>
    %36 = arith.mulf %7, %35 : vector<1x80xf32>
    %37 = arith.mulf %27, %36 : vector<1x80xf32>
    %38 = arith.subf %8, %37 : vector<1x80xf32>
    %39 = vector.broadcast %36 : vector<1x80xf32> to vector<8x80xf32>
    %40 = arith.mulf %15, %39 : vector<8x80xf32>
    %41 = vector.broadcast %38 : vector<1x80xf32> to vector<8x80xf32>
    %42 = arith.addf %40, %41 : vector<8x80xf32>
    %43 = arith.truncf %42 : vector<8x80xf32> to vector<8x80xbf16>
    %cst_21 = arith.constant dense<0.000000e+00> : vector<8x40xf32>
    %44 = tpu.matmul %43, %3, %cst_21 {dimension_numbers = #tpu.dot_dimension_numbers<[1], [0], [0], [1], [0, 0, 1, 1], [], []>} : vector<8x80xbf16>, vector<80x40xbf16>, vector<8x40xf32> -> vector<8x40xf32>
    %45 = vector.broadcast %9 : vector<1x40xf32> to vector<8x40xf32>
    %46 = arith.addf %44, %45 : vector<8x40xf32>
    %cst_22 = arith.constant 0.000000e+00 : f32
    %47 = vector.broadcast %cst_22 : f32 to vector<8x40xf32>
    %48 = arith.maximumf %46, %47 : vector<8x40xf32>
    %49 = arith.truncf %48 : vector<8x40xf32> to vector<8x40xbf16>
    %cst_23 = arith.constant dense<0.000000e+00> : vector<8x20xf32>
    %50 = tpu.matmul %49, %4, %cst_23 {dimension_numbers = #tpu.dot_dimension_numbers<[1], [0], [0], [1], [0, 0, 1, 1], [], []>} : vector<8x40xbf16>, vector<40x20xbf16>, vector<8x20xf32> -> vector<8x20xf32>
    %51 = vector.broadcast %10 : vector<1x20xf32> to vector<8x20xf32>
    %52 = arith.addf %50, %51 : vector<8x20xf32>
    %cst_24 = arith.constant 0.000000e+00 : f32
    %53 = vector.broadcast %cst_24 : f32 to vector<8x20xf32>
    %54 = arith.maximumf %52, %53 : vector<8x20xf32>
    %55 = arith.truncf %54 : vector<8x20xf32> to vector<8x20xbf16>
    %cst_25 = arith.constant dense<0.000000e+00> : vector<8x4xf32>
    %56 = tpu.matmul %55, %5, %cst_25 {dimension_numbers = #tpu.dot_dimension_numbers<[1], [0], [0], [1], [0, 0, 1, 1], [], []>} : vector<8x20xbf16>, vector<20x4xbf16>, vector<8x4xf32> -> vector<8x4xf32>
    %57 = vector.broadcast %11 : vector<1x4xf32> to vector<8x4xf32>
    %58 = arith.addf %56, %57 : vector<8x4xf32>
    %cst_26 = arith.constant dense<0xFF800000> : vector<8xf32>
    %59 = vector.multi_reduction <maximumf>, %58, %cst_26 [1] : vector<8x4xf32> to vector<8xf32>
    %60 = vector.shape_cast %59 : vector<8xf32> to vector<8x1xf32>
    %61 = vector.broadcast %60 : vector<8x1xf32> to vector<8x4xf32>
    %62 = arith.subf %58, %61 : vector<8x4xf32>
    %63 = math.exp %62 : vector<8x4xf32>
    %cst_27 = arith.constant dense<0.000000e+00> : vector<8xf32>
    %64 = vector.multi_reduction <add>, %63, %cst_27 [1] : vector<8x4xf32> to vector<8xf32>
    %65 = vector.shape_cast %64 : vector<8xf32> to vector<8x1xf32>
    %66 = math.log %65 : vector<8x1xf32>
    %67 = vector.broadcast %66 : vector<8x1xf32> to vector<8x4xf32>
    %68 = arith.subf %62, %67 : vector<8x4xf32>
    %c0_28 = arith.constant 0 : index
    %c0_29 = arith.constant 0 : index
    %69 = vector.load %arg3[%c0_28, %c0_29] : memref<8x4xf32, #tpu.memory_space<vmem>>, vector<8x4xf32>
    tpu.vector_store %arg3[%c0_28, %c0_29], %68 {strides = array<i32>} : memref<8x4xf32, #tpu.memory_space<vmem>>, vector<8x4xf32>,
    return
  }
}

</mosaic_0001>

<bundles_post_ra>
// kernel: nn_model_forward.1
= control target key start
LH: loop header
LB: loop body
LE: loop exit
PB: predicated region body
PF: predicated region fallthrough
CT: control target
= control target key end

     0   :  { %8 = vsyncpa [#allocation3], 0  ;;  %s803_s0 = inlined_call_operand.hbm [shape: f32[8,16], index: 0, kind: input, shape index: {}]   ;;  %s804_s1 = inlined_call_operand.hbm [shape: bf16[256,128], index: 1, kind: input, shape index: {}]   ;;  %s805_s2 = inlined_call_operand.hbm [shape: f32[8,128], index: 2, kind: input, shape index: {}]   ;;  %s806_s3 = inlined_call_operand.vmem [shape: f32[8,4], index: 3, kind: output, shape index: {}]  }
   0x1   :  { %9 = vsyncpa [#allocation5], 0  ;;  %s720_s12 = smov [#allocation4]  }
   0x2   :  { %s25_s13 = sshll.u32 %s720_s12, 4  ;;  %s26_s13 = int_to_ptr.vmem [resolvable:$true] %s25_s13 }
   0x3   :  { %s664_s14 = scalar_lea.vmem %s26_s13, 2048  ;;  %p669_p1 = scmp.lt.s32.totalorder %s26_s13, %s26_s13 }
   0x4   :  { %p665_p0 = scmp.ne.s32.totalorder %s26_s13, %s664_s14  ;;  %p670_p2 = scmp.lt.s32.totalorder %s664_s14, %s664_s14 }
   0x6   :  { %p671_p3 = por %p670_p2, %p669_p1 }
   0x8   :  { %p672_p4 = pnand %p671_p3, %p665_p0 }
   0xa   :  { %675 = shalt.err (!%p672_p4)
}
   0xb   :  { %s721_s15 = smov 64   ;;  %s722_s16 = smov 4  }
   0xc   :  { %31 = dma.hbm_to_vmem [thread:$0]  %s804_s1, 2048, %s26_s13, [#allocation5], %s721_s15, %s721_s15, %s722_s16  }
   0xd   :  { %s723_s19 = smov [#allocation2]   ;;  %s724_s21 = smov [#allocation6]  }
   0xe   :  { %s16_s20 = sshll.u32 %s723_s19, 4  ;;  %s38_s22 = sshll.u32 %s724_s21, 4  ;;  %s17_s20 = int_to_ptr.vmem [resolvable:$true] %s16_s20  ;;  %s39_s22 = int_to_ptr.vmem [resolvable:$true] %s38_s22 }
   0xf   :  { %s684_s23 = scalar_lea.vmem %s17_s20, 128  ;;  %p689_p6 = scmp.lt.s32.totalorder %s17_s20, %s17_s20 }
  0x10   :  { %p685_p5 = scmp.ne.s32.totalorder %s17_s20, %s684_s23  ;;  %p690_p7 = scmp.lt.s32.totalorder %s684_s23, %s684_s23 }
  0x12   :  { %p691_p8 = por %p690_p7, %p689_p6 }
  0x14   :  { %p692_p9 = pnand %p691_p8, %p685_p5 }
  0x16   :  { %695 = shalt.err (!%p692_p9)
}
  0x17   :  { %19 = dma.hbm_to_vmem [thread:$0]  %s803_s0, 128, %s17_s20, [#allocation3]  }
  0x18   :  { %s704_s26 = scalar_lea.vmem %s39_s22, 128  ;;  %p709_p11 = scmp.lt.s32.totalorder %s39_s22, %s39_s22 }
  0x19   :  { %p705_p10 = scmp.ne.s32.totalorder %s39_s22, %s704_s26  ;;  %p710_p12 = scmp.lt.s32.totalorder %s704_s26, %s704_s26 }
  0x1b   :  { %p711_p13 = por %p710_p12, %p709_p11 }
  0x1d   :  { %p712_p0 = pnand %p711_p13, %p705_p10 }
  0x1f   :  { %715 = shalt.err (!%p712_p0)
}
  0x20   :  { %41 = dma.hbm_to_vmem [thread:$0]  %s805_s2, 128, %s39_s22, [#allocation5]  }
  0x21   :  { %716 = dma.done.wait [#allocation3], 128  }
  0x22   :  { %717 = vsyncadd [#allocation3], 4294967168 }
  0x23   :  { %718 = dma.done.wait [#allocation5], 2176  }
  0x24   :  { %719 = vsyncadd [#allocation5], 4294965120  ;;  %v725_v0 = vmov 0.0   ;;  %vm726_vm0 = vmmov 0   ;;  %v639_v1 = vld [vmem:[#allocation4] sm:$0xff]   ;;  %v52_v2 = vld [vmem:[#allocation2] sm:$0xff]  ;;  %v260_v56 = vlaneseq }
  0x25   :  { %571 = vmatprep.subr.bf16.mxu0 %v725_v0  ;;  %573 = vmatprep.mubr.msk.bf16.mxu0 %vm726_vm0, %v725_v0  ;;  %vm100_vm1 = vcmask 130048   ;;  %v89_v3 = vpack.c.bf16 %v52_v2, %v52_v2  ;;  %v544_v4 = vld [vmem:[#allocation4 + $0x28] sm:$0xff]   ;;  %v543_v7 = vld [vmem:[#allocation4 + $0x20] sm:$0xff]   ;;  %v542_v10 = vld [vmem:[#allocation4 + $0x18] sm:$0xff]   ;;  %vm144_vm2 = vcmask 654336   ;;  %vm160_vm3 = vcmask 1040384  }
  0x26   :  { %577 = vmatprep.subr.mxu1 %v725_v0  ;;  %597 = vmatprep.mubr.msk.f32.mxu1 %vm726_vm0, %v725_v0  ;;  %v539_v5 = vunpack.c.h.bf16 %v544_v4  ;;  %v538_v6 = vunpack.c.l.bf16 %v544_v4  ;;  %v535_v8 = vunpack.c.h.bf16 %v543_v7  ;;  %v534_v9 = vunpack.c.l.bf16 %v543_v7  ;;  %v541_v13 = vld [vmem:[#allocation4 + $0x10] sm:$0xff]   ;;  %v540_v15 = vld [vmem:[#allocation4 + $0x8] sm:$0xff]   ;;  %v500_v19 = vld [vmem:[#allocation6] ss:$0 sm:$0xff] }
  0x27   :  { %572 = vmatpush3.bf16.msra.mxu0 %v639_v1  ;;  %v531_v11 = vunpack.c.h.bf16 %v542_v10  ;;  %v530_v12 = vunpack.c.l.bf16 %v542_v10  ;;  %v527_v14 = vunpack.c.h.bf16 %v541_v13  ;;  %v526_v16 = vunpack.c.l.bf16 %v541_v13  ;;  %v640_v41 = vld [vmem:[#allocation4 + $0x50] sm:$0xff]   ;;  %v641_v42 = vld [vmem:[#allocation4 + $0x48] sm:$0xff]   ;;  %v642_v43 = vld [vmem:[#allocation4 + $0x40] sm:$0xff]  }
  0x28   :  { %600 = vmatprep.subr.bf16.mxu0 %v725_v0  ;;  %578 = vmatpush3.msra.mxu1 %v539_v5  ;;  %v523_v17 = vunpack.c.h.bf16 %v540_v15  ;;  %v522_v18 = vunpack.c.l.bf16 %v540_v15  ;;  %v643_v44 = vld [vmem:[#allocation4 + $0x38] sm:$0xff]   ;;  %v644_v45 = vld [vmem:[#allocation4 + $0x30] sm:$0xff]   ;;  %v645_v46 = vld [vmem:[#allocation4 + $0x68] ss:$0 sps:$4 sm:$0xff]   ;;  %vm373_vm4 = vcmask 1043456   ;;  %v261_v57 = vshrl.u32 %v260_v56, 7 }
  0x29   :  { %579 = vmatprep.subr.mxu1 %v725_v0  ;;  %v375_v47 = vsel %vm373_vm4, %v645_v46, 0  ;;  %v84_v59 = vld [vmem:[#allocation6 + $0x1] sm:$0x1]  ;;  %v85_v63 = vld [vmem:[#allocation6 + $0x2] sm:$0x1]  ;;  %vm436_vm5 = vcmask 1041408  }
  0x2a   :  { %574 = vmatmul.mubr.msk.bf16.vlgmr.msra.gmra.mxu0 %vm100_vm1, %v89_v3  ;;  %580 = vmatpush3.msra.mxu1 %v538_v6  ;;  %v262_v61 = vsub.s32 0, %v261_v57  ;;  %v648_v10 = vld [vmem:[#allocation4 + $0x78] ss:$0 sps:$4 sm:$0x33]   ;;  %vm369_vm6 = vcmask 326656   ;;  %vm432_vm7 = vcmask 162816  }
  0x2b   :  { %610 = vmatprep.mubr.msk.bf16.mxu0 %vm726_vm0, %v725_v0  ;;  %581 = vmatprep.subr.mxu1 %v725_v0  ;;  %vm480_vm8 = vcmask 31744  }
  0x2c   :  { %582 = vmatpush3.msra.mxu1 %v535_v8  ;;  %601 = vmatpush3.bf16.msra.mxu0 %v640_v41  ;;  %v646_v8 = vld [vmem:[#allocation4 + $0x60] sm:$0xff]  }
  0x2d   :  { %583 = vmatprep.subr.mxu1 %v725_v0  ;;  %602 = vmatprep.subr.bf16.mxu0 %v725_v0 }
  0x2e   :  { %584 = vmatpush3.msra.mxu1 %v534_v9  ;;  %v647_v9 = vld [vmem:[#allocation4 + $0x58] sm:$0xff]  }
  0x2f   :  { %585 = vmatprep.subr.mxu1 %v725_v0 }
  0x30   :  { %586 = vmatpush3.msra.mxu1 %v531_v11  ;;  %603 = vmatpush3.bf16.msra.mxu0 %v641_v42  ;;  %v438_v11 = vsel %vm436_vm5, %v648_v10, 0 }
  0x31   :  { %587 = vmatprep.subr.mxu1 %v725_v0  ;;  %604 = vmatprep.subr.bf16.mxu0 %v725_v0 }
  0x32   :  { %588 = vmatpush3.msra.mxu1 %v530_v12  ;;  %v504_v12 = vld [vmem:[#allocation6 + $0x3] ss:$0 sm:$0xff] }
  0x33   :  { %589 = vmatprep.subr.mxu1 %v725_v0 }
  0x34   :  { %590 = vmatpush3.msra.mxu1 %v527_v14  ;;  %605 = vmatpush3.bf16.msra.mxu0 %v642_v43 }
  0x35   :  { %591 = vmatprep.subr.mxu1 %v725_v0  ;;  %606 = vmatprep.subr.bf16.mxu0 %v725_v0 }
  0x36   :  { %592 = vmatpush3.msra.mxu1 %v526_v16 }
  0x37   :  { %593 = vmatprep.subr.mxu1 %v725_v0 }
  0x38   :  { %594 = vmatpush3.msra.mxu1 %v523_v17  ;;  %607 = vmatpush3.bf16.msra.mxu0 %v643_v44 }
  0x39   :  { %595 = vmatprep.subr.mxu1 %v725_v0  ;;  %608 = vmatprep.subr.bf16.mxu0 %v725_v0 }
  0x3a   :  { %596 = vmatpush3.msra.mxu1 %v522_v18 }
  0x3b   :  { %614 = vmatprep.subr.bf16.mxu1 %v725_v0 }
  0x3c   :  { %609 = vmatpush3.bf16.msra.mxu0 %v644_v45 }
  0x3d   :  { %624 = vmatprep.subr.bf16.mxu0 %v725_v0 }
  0xea   :  { %v138_v20 = vpop.f32.mrf.mxu0 }
  0xeb   :  { %v775_v21 = vadd.f32 %v500_v19, %v138_v20  ;;  %v649_v20 = vld [vmem:[#allocation4 + $0x70] sm:$0xff]  }
  0xec   :  { %v575_v22 = vpop.f32.mrf.mxu0 }
  0xed   :  { %v152_v23 = vmul.f32 %v775_v21, %v775_v21  ;;  %v145_v24 = vsel %vm144_vm2, %v775_v21, 0.0 }
  0xee   :  { %v141_v25 = vpop.f32.mrf.mxu0  ;;  %v146_v26 = vrot.slane %v145_v24, 4 }
  0xef   :  { %v153_v27 = vsel %vm144_vm2, %v152_v23, 0.0 }
  0xf0   :  { %v576_v28 = vpop.f32.mrf.mxu0  ;;  %v147_v29 = vadd.f32 %v146_v26, %v145_v24  ;;  %v154_v30 = vrot.slane %v153_v27, 4 }
  0xf1   :  { %v516_v28 = vld [vmem:[#allocation6 + $0x5] ss:$0 sm:$0xff] }
  0xf2   :  { %v148_v31 = vrot.slane %v147_v29, 2  ;;  %v155_v32 = vadd.f32 %v154_v30, %v153_v27 }
  0xf4   :  { %v149_v33 = vadd.f32 %v148_v31, %v147_v29  ;;  %v156_v34 = vrot.slane %v155_v32, 2 }
  0xf6   :  { %v150_v35 = vrot.slane %v149_v33, 1  ;;  %v157_v36 = vadd.f32 %v156_v34, %v155_v32 }
  0xf8   :  { %v158_v37 = vrot.slane %v157_v36, 1  ;;  %v151_v38 = vadd.f32 %v150_v35, %v149_v33 }
  0xfa   :  { %v159_v39 = vadd.f32 %v158_v37, %v157_v36 }
  0xfc   :  { %v161_v40 = vsel %vm160_vm3, %v151_v38, %v159_v39 }
  0xfd   :  { %598 = vmatmul.mubr.msk.f32.vlgmr.msra.gmra.mxu1 %vm144_vm2, %v161_v40 }
  0xfe   :  { %620 = vmatprep.mubr.msk.bf16.mxu1 %vm726_vm0, %v725_v0  ;;  %615 = vmatpush3.bf16.msra.mxu1 %v375_v47 }
  0xff   :  { %616 = vmatprep.subr.bf16.mxu1 %v725_v0 }
 0x102   :  { %617 = vmatpush3.bf16.msra.mxu1 %v646_v8 }
 0x103   :  { %618 = vmatprep.subr.bf16.mxu1 %v725_v0 }
 0x106   :  { %619 = vmatpush3.bf16.msra.mxu1 %v647_v9 }
 0x1bd   :  { %v241_v48 = vpop.f32.mrf.mxu1 }
 0x1be   :  { %v245_v49 = vmul.f32 0.025, %v241_v48 }
 0x1bf   :  { %v599_v50 = vpop.f32.mrf.mxu1 }
 0x1c0   :  { %v246_v51 = vmul.f32 %v245_v49, %v245_v49 }
 0x1c2   :  { %v248_v52 = vrot.slane %v246_v51, 7 }
 0x1c4   :  { %v250_v53 = vsub.f32 %v245_v49, %v248_v52 }
 0x1c6   :  { %v251_v54 = vmax.f32 %v250_v53, 0.0 }
 0x1c8   :  { %v252_v55 = vadd.f32 1e-05, %v251_v54 }
 0x1ca   :  { %650 = vrsqrt.f32 %v252_v55 }
 0x1d7   :  { %v651_v58 = vpop.eup %650 }
 0x1d8   :  { %v255_v60 = vrot.slane %v651_v58, 1 }
 0x1da   :  { %v257_v62 = vmul.f32 %v255_v60, %v84_v59 }
 0x1dc   :  { %v258_v1 = vmul.f32 %v257_v62, %v245_v49  ;;  %v263_v2 = vrot.slane %v257_v62, %v262_v61 }
 0x1de   :  { %v259_v3 = vsub.f32 %v85_v63, %v258_v1  ;;  %v264_v4 = vmul.f32 %v263_v2, %v775_v21  ;;  %v511_v21 = vld [vmem:[#allocation6 + $0x4] ss:$0 sm:$0xff] }
 0x1e0   :  { %v268_v5 = vrot.slane %v259_v3, %v262_v61 }
 0x1e2   :  { %v269_v6 = vadd.f32 %v268_v5, %v264_v4 }
 0x1e4   :  { %v270_v7 = vpack.c.bf16 %v269_v6, %v269_v6 }
 0x1e6   :  { %611 = vmatmul.mubr.msk.bf16.vlgmr.msra.gmra.mxu0 %vm144_vm2, %v270_v7 }
 0x1e7   :  { %628 = vmatprep.mubr.msk.bf16.mxu0 %vm726_vm0, %v725_v0  ;;  %625 = vmatpush3.bf16.msra.mxu0 %v438_v11 }
 0x1e8   :  { %626 = vmatprep.subr.bf16.mxu0 %v725_v0 }
 0x1eb   :  { %627 = vmatpush3.bf16.msra.mxu0 %v649_v20 }
 0x2a6   :  { %v342_v13 = vpop.f32.mrf.mxu0 }
 0x2a7   :  { %v343_v14 = vadd.f32 %v504_v12, %v342_v13 }
 0x2a8   :  { %v612_v15 = vpop.f32.mrf.mxu0 }
 0x2a9   :  { %v348_v16 = vmax.f32 %v343_v14, 0.0 }
 0x2aa   :  { %v345_v17 = vpop.f32.mrf.mxu0 }
 0x2ab   :  { %v349_v18 = vpack.c.bf16 %v348_v16, %v348_v16 }
 0x2ac   :  { %v613_v19 = vpop.f32.mrf.mxu0 }
 0x2ad   :  { %621 = vmatmul.mubr.msk.bf16.vlgmr.msra.gmra.mxu1 %vm369_vm6, %v349_v18 }
 0x36d   :  { %v411_v22 = vpop.f32.mrf.mxu1 }
 0x36e   :  { %v412_v23 = vadd.f32 %v511_v21, %v411_v22 }
 0x36f   :  { %v622_v24 = vpop.f32.mrf.mxu1 }
 0x370   :  { %v417_v25 = vmax.f32 %v412_v23, 0.0 }
 0x371   :  { %v414_v26 = vpop.f32.mrf.mxu1 }
 0x372   :  { %v418_v0 = vpack.c.bf16 %v417_v25, %v417_v25 }
 0x373   :  { %v623_v27 = vpop.f32.mrf.mxu1 }
 0x374   :  { %629 = vmatmul.mubr.msk.bf16.vlgmr.msra.gmra.mxu0 %vm432_vm7, %v418_v0 }
 0x434   :  { %v474_v29 = vpop.f32.mrf.mxu0 }
 0x435   :  { %v475_v30 = vadd.f32 %v516_v28, %v474_v29 }
 0x436   :  { %v630_v31 = vpop.f32.mrf.mxu0 }
 0x437   :  { %v481_v32 = vsel %vm480_vm8, %v475_v30, -inf }
 0x438   :  { %482 = vmax.xlane.f32.xlu0 %v481_v32  ;;  %v477_v33 = vpop.f32.mrf.mxu0 }
 0x43a   :  { %v631_v34 = vpop.f32.mrf.mxu0 }
 0x4c1   :  { %v483_v35 = vpop.xlane.xlu0 %482 }
 0x4c2   :  { %v484_v36 = vsub.f32 %v475_v30, %v483_v35 }
 0x4c4   :  { %v485_v37 = vmul.f32 1.442695, %v484_v36 }
 0x4c6   :  { %652 = vpow2.f32 %v485_v37 }
 0x4d3   :  { %v653_v38 = vpop.eup %652 }
 0x4d4   :  { %v487_v39 = vsel %vm480_vm8, %v653_v38, 0.0 }
 0x4d5   :  { %488 = vadd.xlane.f32.xlu0 %v487_v39 }
 0x55e   :  { %v489_v40 = vpop.xlane.xlu0 %488 }
 0x55f   :  { %654 = vlog2.f32 %v489_v40 }
 0x56c   :  { %v655_v41 = vpop.eup %654 }
 0x56d   :  { %v491_v42 = vmul.f32 0.6931472, %v655_v41 }
 0x56f   :  { %v492_v43 = vsub.f32 %v484_v36, %v491_v42 }
 0x571   :  { %493 = vst.msk [vmem:[%s806_s3] sm:$0xff] %vm480_vm8, %v492_v43 }
 0x572   :  { %498 = vsyncpa [#allocation3], 1 }
 0x573   :  { %499 = vsyncpa [#allocation5], 1 }

</bundles_post_ra>
